<compile_context>
chip_gen: v5e
topology: v5e:2x2
jax: 0.10.0
libtpu: 0.0.40
codegen_flags: <defaults>
</compile_context>

<pallas_src>
import functools

import jax
import jax.numpy as jnp
from jax.experimental import pallas as pl
from jax.experimental.pallas import tpu as pltpu


# ----------------------------------------------------------------------------
# Pallas kernels
# ----------------------------------------------------------------------------
def _gcn_norm_kernel(adj_ref, dinv_row_ref, dinv_col_ref, o_ref):
    """A_hat tile = d_i^{-1/2} * A[tile] * d_j^{-1/2}, cast to compute dtype."""
    a = adj_ref[...]                                   # (tile_n, N) f32
    o_ref[...] = (dinv_row_ref[...] * a * dinv_col_ref[...]).astype(o_ref.dtype)


def _propagate_kernel(adj_ref, h_ref, o_ref, acc_ref):
    """One hop: h_out[tile] = A_hat[tile, :] @ h, contraction blocked over k."""
    @pl.when(pl.program_id(1) == 0)
    def _():
        acc_ref[...] = jnp.zeros_like(acc_ref)

    acc_ref[...] += jnp.dot(adj_ref[...], h_ref[...],
                            preferred_element_type=jnp.float32)

    @pl.when(pl.program_id(1) == pl.num_programs(1) - 1)
    def _():
        o_ref[...] = acc_ref[...].astype(o_ref.dtype)


def _tag_combine_kernel(apply_relu, num_hops, adj_ref, hprev_ref, *rest):
    """Fused last hop + combine:

        h_K[tile]  = A_hat[tile, :] @ h_{K-1}          (k-blocked, f32 acc)
        out[tile]  = [h_0 | h_1 | ... | h_K][tile] @ W_stacked + b   (+ relu)

    rest = (hop_0_ref, ..., hop_{K-1}_ref, w_ref, b_ref, o_ref, acc_ref)
    """
    hop_refs = rest[:num_hops]
    w_ref, b_ref, o_ref, acc_ref = rest[num_hops:]

    k = pl.program_id(1)

    @pl.when(k == 0)
    def _():
        acc_ref[...] = jnp.zeros_like(acc_ref)

    acc_ref[...] += jnp.dot(adj_ref[...], hprev_ref[...],
                            preferred_element_type=jnp.float32)

    @pl.when(k == pl.num_programs(1) - 1)
    def _():
        f = hop_refs[0].shape[-1]
        h_last = acc_ref[...].astype(w_ref.dtype)
        if f % 128 == 0:
            # lane-aligned hop widths: one deep-contraction MXU matmul
            z = jnp.concatenate([r[...] for r in hop_refs] + [h_last], axis=-1)
            out = jnp.dot(z, w_ref[...], preferred_element_type=jnp.float32)
        else:
            # fallback: per-hop matmuls against static row-slices of stacked W
            out = jnp.dot(h_last, w_ref[num_hops * f:, :],
                          preferred_element_type=jnp.float32)
            for j, r in enumerate(hop_refs):
                out += jnp.dot(r[...], w_ref[j * f:(j + 1) * f, :],
                               preferred_element_type=jnp.float32)
        out = out + b_ref[...]
        if apply_relu:
            out = jnp.maximum(out, 0.0)
        o_ref[...] = out.astype(o_ref.dtype)


# ----------------------------------------------------------------------------
# Helpers
# ----------------------------------------------------------------------------
def _vmem_limit(*buffers):
    """Rough per-grid-step VMEM footprint (double-buffered). Returns None when
    the default scoped limit is plenty, else a raised limit with headroom."""
    nbytes = 0
    for shape, dtype in buffers:
        n = 1
        for s in shape:
            n *= int(s)
        nbytes += n * jnp.dtype(dtype).itemsize
    total = 2 * nbytes                       # double buffering
    if total <= 24 * 1024 * 1024:            # default scoped limit is enough
        return None
    return min(int(total * 1.25) + (2 << 20), 64 << 20)


def _compiler_params(dimension_semantics, vmem_limit_bytes):
    kwargs = dict(dimension_semantics=dimension_semantics)
    if vmem_limit_bytes is not None:
        kwargs["vmem_limit_bytes"] = vmem_limit_bytes
    return pltpu.CompilerParams(**kwargs)


# ----------------------------------------------------------------------------
# Wrappers
# ----------------------------------------------------------------------------
def gcn_normalize(adj, *, tile_n, out_dtype):
    """A_hat = D^{-1/2} A D^{-1/2}, computed once and reused by every layer/hop."""
    N = adj.shape[0]
    assert adj.shape == (N, N) and N % tile_n == 0
    adj = adj.astype(jnp.float32)
    deg = jnp.sum(adj, axis=1)
    dinv = jnp.where(deg > 0.0, jax.lax.rsqrt(deg), 0.0).astype(jnp.float32)

    lim = _vmem_limit(((tile_n, N), jnp.float32),
                      ((tile_n, 1), jnp.float32),
                      ((1, N), jnp.float32),
                      ((tile_n, N), out_dtype))
    return pl.pallas_call(
        _gcn_norm_kernel,
        out_shape=jax.ShapeDtypeStruct((N, N), out_dtype),
        grid_spec=pltpu.PrefetchScalarGridSpec(
            num_scalar_prefetch=0,
            grid=(N // tile_n,),
            in_specs=[
                pl.BlockSpec((tile_n, N), lambda i: (i, 0)),
                pl.BlockSpec((tile_n, 1), lambda i: (i, 0)),
                pl.BlockSpec((1, N), lambda i: (0, 0)),
            ],
            out_specs=pl.BlockSpec((tile_n, N), lambda i: (i, 0)),
        ),
        compiler_params=_compiler_params(("parallel",), lim),
    )(adj, dinv.reshape(N, 1), dinv.reshape(1, N))


def propagate(adj_hat, h, *, tile_n, tile_k):
    """h_next = A_hat @ h  (one graph hop), k-blocked contraction."""
    N = adj_hat.shape[0]
    F = h.shape[1]
    assert N % tile_n == 0 and N % tile_k == 0

    lim = _vmem_limit(((tile_n, tile_k), adj_hat.dtype),
                      ((tile_k, F), h.dtype),
                      ((tile_n, F), h.dtype),
                      ((tile_n, F), jnp.float32))
    return pl.pallas_call(
        _propagate_kernel,
        out_shape=jax.ShapeDtypeStruct((N, F), h.dtype),
        grid_spec=pltpu.PrefetchScalarGridSpec(
            num_scalar_prefetch=0,
            grid=(N // tile_n, N // tile_k),
            in_specs=[
                pl.BlockSpec((tile_n, tile_k), lambda i, k: (i, k)),  # A_hat tile
                pl.BlockSpec((tile_k, F), lambda i, k: (k, 0)),       # h (contraction block)
            ],
            out_specs=pl.BlockSpec((tile_n, F), lambda i, k: (i, 0)),
            scratch_shapes=[pltpu.VMEM((tile_n, F), jnp.float32)],
        ),
        compiler_params=_compiler_params(("parallel", "arbitrary"), lim),
    )(adj_hat, h)


def tag_conv_combine(adj_hat, hops, w, b, *, apply_relu, out_dtype, tile_n, tile_k):
    """Fused last hop + stacked-weight combine. hops = [h_0, ..., h_{K-1}]."""
    N = adj_hat.shape[0]
    F = hops[0].shape[1]
    H = w.shape[1]
    K = len(hops)
    assert w.shape[0] == (K + 1) * F
    assert N % tile_n == 0 and N % tile_k == 0

    kernel = functools.partial(_tag_combine_kernel, apply_relu, K)
    hop_specs = [pl.BlockSpec((tile_n, F), lambda i, k: (i, 0)) for _ in range(K)]

    lim = _vmem_limit(
        ((tile_n, tile_k), adj_hat.dtype),
        ((tile_k, F), hops[-1].dtype),
        *[((tile_n, F), hh.dtype) for hh in hops],
        (w.shape, w.dtype),
        (b.shape, b.dtype),
        ((tile_n, H), out_dtype),
        ((tile_n, F), jnp.float32),
    )
    return pl.pallas_call(
        kernel,
        out_shape=jax.ShapeDtypeStruct((N, H), out_dtype),
        grid_spec=pltpu.PrefetchScalarGridSpec(
            num_scalar_prefetch=0,
            grid=(N // tile_n, N // tile_k),
            in_specs=[
                pl.BlockSpec((tile_n, tile_k), lambda i, k: (i, k)),  # A_hat tile
                pl.BlockSpec((tile_k, F), lambda i, k: (k, 0)),       # h_{K-1}, k-blocked
            ] + hop_specs + [
                pl.BlockSpec(((K + 1) * F, H), lambda i, k: (0, 0)),  # stacked W
                pl.BlockSpec((1, H), lambda i, k: (0, 0)),            # bias
            ],
            out_specs=pl.BlockSpec((tile_n, H), lambda i, k: (i, 0)),
            scratch_shapes=[pltpu.VMEM((tile_n, F), jnp.float32)],
        ),
        compiler_params=_compiler_params(("parallel", "arbitrary"), lim),
    )(adj_hat, hops[-1], *hops, w, b)


def tag_conv(x, adj_hat, w, b, *, K, apply_relu, out_dtype, tile_n, tile_k):
    """One TAGConv layer: out = sum_{k=0..K} (A_hat^k x) W_k + b."""
    hops = [x]
    for _ in range(K - 1):
        hops.append(propagate(adj_hat, hops[-1], tile_n=tile_n, tile_k=tile_k))
    return tag_conv_combine(adj_hat, hops, w, b, apply_relu=apply_relu,
                            out_dtype=out_dtype, tile_n=tile_n, tile_k=tile_k)


def tagc_forward(x, adj, params, *, K=3, tile_n=128, tile_k=128,
                 compute_dtype=jnp.bfloat16):
    """params: list of (W_stacked ((K+1)*F_in, F_out), bias (1, F_out)) per layer."""
    N = x.shape[0]
    tile_n = min(tile_n, N)
    tile_k = min(tile_k, N)

    adj_hat = gcn_normalize(adj, tile_n=tile_n, out_dtype=compute_dtype)
    h = x.astype(compute_dtype)
    L = len(params)
    for li, (w, b) in enumerate(params):
        last = li == L - 1
        h = tag_conv(h, adj_hat, w.astype(compute_dtype), b.astype(jnp.float32),
                     K=K, apply_relu=not last,
                     out_dtype=jnp.float32 if last else compute_dtype,
                     tile_n=tile_n, tile_k=tile_k)
        # F.dropout(training=False) == identity
    return h


# ----------------------------------------------------------------------------
# Pure-JAX reference (same bf16 cast points, f32 accumulation)
# ----------------------------------------------------------------------------
def tagc_ref(x, adj, params, *, K=3, compute_dtype=jnp.bfloat16):
    adj = adj.astype(jnp.float32)
    deg = jnp.sum(adj, axis=1)
    dinv = jnp.where(deg > 0.0, jax.lax.rsqrt(deg), 0.0)
    adj_hat = (dinv[:, None] * adj * dinv[None, :]).astype(compute_dtype)

    h = x.astype(compute_dtype)
    L = len(params)
    for li, (w, b) in enumerate(params):
        wc = w.astype(compute_dtype)
        parts = [h]
        hop = h
        for _ in range(K):
            hop = jnp.dot(adj_hat, hop,
                          preferred_element_type=jnp.float32).astype(compute_dtype)
            parts.append(hop)
        z = jnp.concatenate(parts, axis=-1)
        out = jnp.dot(z, wc, preferred_element_type=jnp.float32) + b.astype(jnp.float32)
        if li < L - 1:
            out = jnp.maximum(out, 0.0)
            h = out.astype(compute_dtype)
        else:
            h = out
    return h


# ----------------------------------------------------------------------------
# Deterministic parameter init + demo
# ----------------------------------------------------------------------------
def init_params(key, in_channels, hidden_channels, out_channels, num_layers, K):
    dims = [in_channels] + [hidden_channels] * (num_layers - 1) + [out_channels]
    params = []
    for li in range(num_layers):
        f_in, f_out = dims[li], dims[li + 1]
        key, kw, kb = jax.random.split(key, 3)
        scale = (6.0 / (f_in + f_out)) ** 0.5
        # one glorot-ish weight per hop, pre-stacked along the contraction axis
        w = jax.random.uniform(kw, ((K + 1) * f_in, f_out), jnp.float32, -scale, scale)
        b = 0.1 * jax.random.normal(kb, (1, f_out), jnp.float32)
        params.append((w, b))
    return params


if __name__ == "__main__":
    # Small but MXU/lane-friendly shapes (feature widths multiples of 128,
    # node count a multiple of the 128-row tile).
    N = 256
    IN_C = 128
    HIDDEN = 128
    OUT_C = 128
    NUM_LAYERS = 3
    K = 3
    DROPOUT = 0.5     # inference: identity

    key = jax.random.PRNGKey(0)
    kx, kadj, kp = jax.random.split(key, 3)

    x = jax.random.normal(kx, (N, IN_C), dtype=jnp.float32)
    adj = (jax.random.uniform(kadj, (N, N)) < 0.1).astype(jnp.float32)

    params = init_params(kp, IN_C, HIDDEN, OUT_C, NUM_LAYERS, K)

    out = tagc_forward(x, adj, params, K=K, tile_n=128, tile_k=128)
    out = jax.block_until_ready(out)

    ref = tagc_ref(x, adj, params, K=K)
    assert out.shape == (N, OUT_C), out.shape
    max_err = float(jnp.max(jnp.abs(out - ref)))
    assert jnp.allclose(out, ref, rtol=1e-2, atol=1e-2), max_err

    print("KERNEL_OK")
</pallas_src>

<mosaic_0001>
module attributes {stable_mosaic.version = 11 : i64} {
  func.func @_gcn_norm_kernel(%arg0: i32, %arg1: memref<128x256xf32, #tpu.memory_space<vmem>>, %arg2: memref<128x1xf32, #tpu.memory_space<vmem>>, %arg3: memref<1x256xf32, #tpu.memory_space<vmem>>, %arg4: memref<128x256xbf16, #tpu.memory_space<vmem>>) attributes {dimension_semantics = [#tpu.dimension_semantics<parallel>], iteration_bounds = array<i64: 2>, scalar_prefetch = 0 : i64, scratch_operands = 0 : i64, tpu.core_type = #tpu.core_type<tc>, window_params = [{transform_indices = @transform_0, window_bounds = array<i64: 128, 256>}, {transform_indices = @transform_1, window_bounds = array<i64: 128, 1>}, {pipeline_mode = #tpu.pipeline_mode<synchronous>, transform_indices = @transform_2, window_bounds = array<i64: 1, 256>}, {transform_indices = @transform_3, window_bounds = array<i64: 128, 256>}]} {
    %c0 = arith.constant 0 : index
    %c0_0 = arith.constant 0 : index
    %0 = vector.load %arg1[%c0, %c0_0] : memref<128x256xf32, #tpu.memory_space<vmem>>, vector<128x256xf32>
    %c0_1 = arith.constant 0 : index
    %c0_2 = arith.constant 0 : index
    %1 = vector.load %arg2[%c0_1, %c0_2] : memref<128x1xf32, #tpu.memory_space<vmem>>, vector<128x1xf32>
    %2 = vector.broadcast %1 : vector<128x1xf32> to vector<128x256xf32>
    %3 = arith.mulf %2, %0 : vector<128x256xf32>
    %c0_3 = arith.constant 0 : index
    %c0_4 = arith.constant 0 : index
    %4 = vector.load %arg3[%c0_3, %c0_4] : memref<1x256xf32, #tpu.memory_space<vmem>>, vector<1x256xf32>
    %5 = vector.broadcast %4 : vector<1x256xf32> to vector<128x256xf32>
    %6 = arith.mulf %3, %5 : vector<128x256xf32>
    %7 = arith.truncf %6 : vector<128x256xf32> to vector<128x256xbf16>
    %c0_5 = arith.constant 0 : index
    %c0_6 = arith.constant 0 : index
    %8 = vector.load %arg4[%c0_5, %c0_6] : memref<128x256xbf16, #tpu.memory_space<vmem>>, vector<128x256xbf16>
    tpu.vector_store %arg4[%c0_5, %c0_6], %7 {strides = array<i32>} : memref<128x256xbf16, #tpu.memory_space<vmem>>, vector<128x256xbf16>,
    return
  }
  func.func @transform_0(%arg0: i32) -> (i32, i32) {
    %c0_i32 = arith.constant 0 : i32
    %c0_i32_0 = arith.constant 0 : i32
    return %arg0, %c0_i32 : i32, i32
  }
  func.func @transform_1(%arg0: i32) -> (i32, i32) {
    %c0_i32 = arith.constant 0 : i32
    %c0_i32_0 = arith.constant 0 : i32
    return %arg0, %c0_i32 : i32, i32
  }
  func.func @transform_2(%arg0: i32) -> (i32, i32) {
    %c0_i32 = arith.constant 0 : i32
    %c0_i32_0 = arith.constant 0 : i32
    %c0_i32_1 = arith.constant 0 : i32
    return %c0_i32, %c0_i32_0 : i32, i32
  }
  func.func @transform_3(%arg0: i32) -> (i32, i32) {
    %c0_i32 = arith.constant 0 : i32
    %c0_i32_0 = arith.constant 0 : i32
    return %arg0, %c0_i32 : i32, i32
  }
}

</mosaic_0001>

<bundles_post_ra>
// kernel: tpu_custom_call.1
= control target key start
LH: loop header
LB: loop body
LE: loop exit
PB: predicated region body
PF: predicated region fallthrough
CT: control target
= control target key end

     0   :  { %8 = vsyncpa [#allocation3], 0  ;;  %s989_s0 = inlined_call_operand.hbm [shape: f32[256,256], index: 0, kind: input, shape index: {}]   ;;  %s990_s1 = inlined_call_operand.vmem [shape: f32[256,1], index: 1, kind: input, shape index: {}]   ;;  %s991_s2 = inlined_call_operand.vmem [shape: f32[1,256], index: 2, kind: input, shape index: {}]   ;;  %s992_s3 = inlined_call_operand.hbm [shape: bf16[256,256], index: 3, kind: output, shape index: {}]  }
   0x1   :  { %10 = vsyncpa [#allocation3 + $0x1], 0 }
   0x2   :  { %11 = vsyncpa [#allocation4], 0 }
   0x3   :  { %13 = vsyncpa [#allocation4 + $0x1], 0  ;;  %s747_s12 = smov 0   ;;  %s749_s13 = smov 0  }
   0x4   :  { %s751_s14 = smov 0   ;;  %s753_s15 = smov 0  }
   0x5 LB: > { %s768_s16 = sadd.s32 4294967295, %s720_s15   ;;  %s548_s17 = sadd.s32 4294967294, %s720_s15   ;;  %s720_s15 = sphi %s753_s15, %s1002_s15   ;;  %s716_s14 = sphi %s751_s14, %s1001_s14   ;;  %s712_s13 = sphi %s749_s13, %s1000_s13   ;;  %s708_s12 = sphi %s747_s12, %s999_s12  }
   0x6   : > { %s772_s18 = sadd.s32 1, %s720_s15   ;;  %s26_s19 = sadd.s32 1, %s716_s14 }
   0x7   : > { %s23_s20 = ssub.s32 %s720_s15, %s772_s18  ;;  %p33_p0 = scmp.ne.s32.totalorder %s716_s14, %s712_s13 }
   0x8   : > { %p24_p1 = scmp.eq.s32.totalorder %s23_s20, 0  ;;  %p34_p2 = scmp.eq.s32.totalorder %s720_s15, 0 }
   0x9   : > { %p39_p3 = scmp.ne.s32.totalorder %s712_s13, %s708_s12  ;;  %p40_p4 = scmp.eq.s32.totalorder %s768_s16, 0 }
   0xa   : > { %s784_s21 = scalar_select %p24_p1, %s716_s14, %s26_s19  }
   0xb   : > { %p786_p5 = por %p34_p2, %p33_p0  ;;  %p790_p6 = por %p40_p4, %p39_p3 }
   0xc   : > { %p110_p7 = scmp.eq.s32.totalorder %s768_s16, 1  ;;  %p116_p8 = scmp.eq.s32.totalorder %s548_s17, 1 }
   0xd   : > { %p582_p10 = scmp.lt.s32.totalorder %s720_s15, 2  ;;  %s139_s26 = sand.u32 1, %s716_s14  }
   0xe   : > { %p797_p11 = por %p110_p7, %p33_p0  ;;  %p801_p12 = por %p116_p8, %p39_p3 }
   0xf   : > { %s567_s27 = sshll.u32 %s720_s15, 8  ;;  %s551_s28 = sshll.u32 %s139_s26, 8 }
  0x10   : > { %s149_s4 = scalar_lea.hbm %s989_s0, %s567_s27  ;;  %s143_s6 = scalar_lea.vmem [#allocation2], %s551_s28 }
  0x11   : > { %s150_s5 = sshll.u32 %s149_s4, 4  ;;  %s152_s7 = sshll.u32 %s143_s6, 4  ;;  %s151_s5 = int_to_ptr.hbm [resolvable:$true] %s150_s5  ;;  %s153_s7 = int_to_ptr.vmem [resolvable:$true] %s152_s7 }
  0x12   : > { %p812_p13 = pnand %p582_p10, %p786_p5  ;;  %p555_p0 = scmp.ge.s32.totalorder %s720_s15, 1 }
  0x13   : > { %p169_p1 = scmp.lt.s32.totalorder %s720_s15, 3  ;;  %s140_s9 = scalar_lea.sflag [#allocation3], %s139_s26 }
  0x14   : > { %s624_s10 = sshra.s32 %s151_s5, 4  ;;  %p628_p3 = pneg %p812_p13  ;;  %s625_s10 = int_to_ptr.hbm [resolvable:$true] %s624_s10 }
  0x15   : > { %s626_s11 = scalar_lea.hbm %s625_s10, 256  ;;  %s631_s20 = scalar_lea.hbm %s989_s0, 512 }
  0x16   : > { %p627_p2 = scmp.ne.s32.totalorder %s625_s10, %s626_s11  ;;  %p632_p5 = scmp.lt.s32.totalorder %s625_s10, %s989_s0 }
  0x17   : > { %p633_p8 = scmp.lt.s32.totalorder %s631_s20, %s626_s11 }
  0x18   : > { %p629_p4 = pnand %p628_p3, %p627_p2 }
  0x19   : > { %p634_p10 = por %p633_p8, %p632_p5 }
  0x1a   : > { %p630_p7 = pneg %p629_p4 }
  0x1c   : > { %p635_p9 = pnand %p634_p10, %p630_p7 }
  0x1e   : > { %638 = shalt.err (!%p635_p9)
}
  0x1f   : > { %s722_s26 = smov 256   ;;  %s723_s28 = smov 16  }
  0x20   : > { %577 = dma.hbm_to_vmem [thread:$0]  (!%p812_p13), %s151_s5, 4096, %s153_s7, %s140_s9, %s722_s26, %s722_s26, %s723_s28  }
  0x21   : > { %p170_p2 = pnand %p555_p0, %p169_p1 }
  0x22   : > { %s833_s29 = sand.u32 (!%p170_p2), 1, %s712_s13  }
  0x23   : > { %173 = sbr.rel (%p170_p2) target bundleno = 214 (0xd6), region = 32  ;;  %s556_s30 = sshll.u32 (!%p170_p2), %s833_s29, 8 }
  0x24   : > { %s176_s4 = scalar_lea.sflag (!%p170_p2), [#allocation3], %s833_s29  ;;  %s837_s6 = scalar_lea.vmem (!%p170_p2), [#allocation2], %s556_s30 }
  0x28   : > { %699 = dma.done.wait (%p790_p6), %s176_s4, 4096  }
  0x29   : > { %701 = vsyncadd (%p790_p6), %s176_s4, 4294963200  ;;  %s558_s5 = sshll.u32 %s768_s16, 4  ;;  %v724_v0 = vmov 0   ;;  %v376_v17 = vld [vmem:[%s991_s2] sm:$0x3]  ;;  %v225_v19 = vld [vmem:[%s837_s6 + $0x48] sm:$0xff] }
  0x2a   : > { %623 = vset.pattern.permute.xlu2 %v724_v0  ;;  %622 = vset.pattern.permute.xlu1 %v724_v0  ;;  %p210_p9 = scmp.lt.s32.totalorder %s558_s5, 31  ;;  %v224_v18 = vld [vmem:[%s837_s6 + $0x40] sm:$0xff]  ;;  %v870_v21 = vperm.slane %v376_v17, 0  ;;  %v872_v22 = vperm.slane %v376_v17, 1  ;;  %s557_s17 = sshll.u32 %s833_s29, 7  ;;  %v226_v28 = vld [vmem:[%s837_s6 + $0x50] sm:$0xff] }
  0x2b   : > { %621 = vset.pattern.permute.xlu0 %v724_v0  ;;  %v227_v29 = vld [vmem:[%s837_s6 + $0x58] sm:$0xff]  ;;  %s879_s19 = scalar_lea.vmem [#allocation5], %s557_s17  ;;  %v232_v36 = vld [vmem:[%s837_s6 + $0x80] sm:$0xff]  ;;  %v233_v37 = vld [vmem:[%s837_s6 + $0x88] sm:$0xff]  ;;  %s569_s20 = sshll.u32 %s768_s16, 7 }
  0x2c   : > { %s1004_s5 = smov (!%p210_p9, %s558_s5), 31  ;;  %v238_v44 = vld [vmem:[%s837_s6 + $0xb0] sm:$0xff]  ;;  %v239_v45 = vld [vmem:[%s837_s6 + $0xb8] sm:$0xff]  ;;  %v220_v46 = vld [vmem:[%s837_s6 + $0x20] sm:$0xff]  ;;  %s459_s26 = scalar_lea.hbm %s992_s3, %s569_s20 }
  0x2d   : > { %s559_s7 = sshll.u32 %s1004_s5, 3  ;;  %v221_v47 = vld [vmem:[%s837_s6 + $0x28] sm:$0xff]  ;;  %v216_v48 = vld [vmem:[%s837_s6] sm:$0xff]  ;;  %s460_s28 = sshll.u32 %s879_s19, 4  ;;  %s461_s28 = int_to_ptr.vmem [resolvable:$true] %s460_s28 }
  0x2e   : > { %s847_s10 = scalar_lea.vmem %s990_s1, %s559_s7  ;;  %v217_v49 = vld [vmem:[%s837_s6 + $0x8] sm:$0xff]  ;;  %s462_s30 = sshll.u32 %s459_s26, 4  ;;  %s463_s30 = int_to_ptr.hbm [resolvable:$true] %s462_s30 }
  0x2f   : > { %v252_v1 = vld [vmem:[%s847_s10 + $0x20] sm:$0xff]  ;;  %v250_v2 = vld [vmem:[%s847_s10 + $0x10] sm:$0xff]  ;;  %v253_v4 = vld [vmem:[%s847_s10 + $0x28] sm:$0xff]  ;;  %s447_s16 = scalar_lea.sflag [#allocation4], %s833_s29  ;;  %s668_s4 = sshra.s32 %s463_s30, 4  ;;  %s669_s4 = int_to_ptr.hbm [resolvable:$true] %s668_s4 }
  0x30   : > { %v248_v3 = vld [vmem:[%s847_s10] sm:$0xff]  ;;  %286 = vperm.xlu2 %623, %v252_v1   ;;  %276 = vperm.xlu1 %622, %v250_v2   ;;  %v251_v5 = vld [vmem:[%s847_s10 + $0x18] sm:$0xff]  ;;  %v249_v6 = vld [vmem:[%s847_s10 + $0x8] sm:$0xff]  ;;  %s674_s8 = scalar_lea.hbm %s992_s3, 256  ;;  %p675_p1 = scmp.lt.s32.totalorder %s669_s4, %s992_s3 }
  0x31   : > { %266 = vperm.xlu0 %621, %v248_v3   ;;  %v256_v7 = vld [vmem:[%s847_s10 + $0x40] sm:$0xff]  ;;  %v255_v8 = vld [vmem:[%s847_s10 + $0x38] sm:$0xff]  ;;  %v254_v9 = vld [vmem:[%s847_s10 + $0x30] sm:$0xff] }
  0x32   : > { %v259_v10 = vld [vmem:[%s847_s10 + $0x58] sm:$0xff]  ;;  %v258_v11 = vld [vmem:[%s847_s10 + $0x50] sm:$0xff]  ;;  %v257_v12 = vld [vmem:[%s847_s10 + $0x48] sm:$0xff] }
  0x33   : > { %v262_v13 = vld [vmem:[%s847_s10 + $0x70] sm:$0xff]  ;;  %v261_v14 = vld [vmem:[%s847_s10 + $0x68] sm:$0xff]  ;;  %v260_v15 = vld [vmem:[%s847_s10 + $0x60] sm:$0xff] }
  0x34   : > { %v263_v16 = vld [vmem:[%s847_s10 + $0x78] sm:$0xff]  ;;  %v244_v3 = vld [vmem:[%s837_s6 + $0xe0] sm:$0xff] }
  0x38   : > { %291 = vperm.xlu2 %623, %v253_v4   ;;  %281 = vperm.xlu1 %622, %v251_v5   ;;  %v245_v5 = vld [vmem:[%s837_s6 + $0xe8] sm:$0xff] }
  0x39   : > { %271 = vperm.xlu0 %621, %v249_v6   ;;  %v222_v6 = vld [vmem:[%s837_s6 + $0x30] sm:$0xff] }
  0x40   : > { %306 = vperm.xlu2 %623, %v256_v7   ;;  %301 = vperm.xlu1 %622, %v255_v8   ;;  %v223_v7 = vld [vmem:[%s837_s6 + $0x38] sm:$0xff]  ;;  %v218_v8 = vld [vmem:[%s837_s6 + $0x10] sm:$0xff] }
  0x41   : > { %296 = vperm.xlu0 %621, %v254_v9   ;;  %v219_v9 = vld [vmem:[%s837_s6 + $0x18] sm:$0xff] }
  0x48   : > { %321 = vperm.xlu2 %623, %v259_v10   ;;  %316 = vperm.xlu1 %622, %v258_v11  }
  0x49   : > { %311 = vperm.xlu0 %621, %v257_v12  }
  0x50   : > { %336 = vperm.xlu2 %623, %v262_v13   ;;  %331 = vperm.xlu1 %622, %v261_v14  }
  0x51   : > { %326 = vperm.xlu0 %621, %v260_v15  }
  0x59   : > { %341 = vperm.xlu0 %621, %v263_v16  }
  0x8a   : > { %v287_v20 = vpop.permute.xlu2 %286 }
  0x8b   : > { %v352_v23 = vmul.f32 %v287_v20, %v224_v18  ;;  %v353_v24 = vmul.f32 %v287_v20, %v225_v19 }
  0x8d   : > { %v390_v25 = vmul.f32 %v870_v21, %v352_v23  ;;  %v391_v26 = vmul.f32 %v872_v22, %v353_v24 }
  0x8f   : > { %v418_v27 = vpack.c.bf16 %v391_v26, %v390_v25 }
  0x91   : > { %434 = vst [vmem:[%s879_s19 + $0x20] sm:$0xff] %v418_v27 }
  0x92   : > { %v292_v30 = vpop.permute.xlu2 %291 }
  0x93   : > { %v354_v31 = vmul.f32 %v292_v30, %v226_v28  ;;  %v355_v32 = vmul.f32 %v292_v30, %v227_v29  ;;  %v230_v30 = vld [vmem:[%s837_s6 + $0x70] sm:$0xff] }
  0x95   : > { %v392_v33 = vmul.f32 %v870_v21, %v354_v31  ;;  %v393_v34 = vmul.f32 %v872_v22, %v355_v32  ;;  %v231_v31 = vld [vmem:[%s837_s6 + $0x78] sm:$0xff]  ;;  %v228_v32 = vld [vmem:[%s837_s6 + $0x60] sm:$0xff] }
  0x97   : > { %v419_v35 = vpack.c.bf16 %v393_v34, %v392_v33  ;;  %v229_v33 = vld [vmem:[%s837_s6 + $0x68] sm:$0xff] }
  0x99   : > { %435 = vst [vmem:[%s879_s19 + $0x28] sm:$0xff] %v419_v35 }
  0x9a   : > { %v307_v38 = vpop.permute.xlu2 %306 }
  0x9b   : > { %v360_v39 = vmul.f32 %v307_v38, %v232_v36  ;;  %v361_v40 = vmul.f32 %v307_v38, %v233_v37 }
  0x9d   : > { %v398_v41 = vmul.f32 %v870_v21, %v360_v39  ;;  %v399_v42 = vmul.f32 %v872_v22, %v361_v40 }
  0x9f   : > { %v422_v43 = vpack.c.bf16 %v399_v42, %v398_v41 }
  0xa1   : > { %438 = vst [vmem:[%s879_s19 + $0x40] sm:$0xff] %v422_v43 }
  0xa2   : > { %v322_v50 = vpop.permute.xlu2 %321  ;;  %v277_v51 = vpop.permute.xlu1 %276 }
  0xa3   : > { %v366_v52 = vmul.f32 %v322_v50, %v238_v44  ;;  %v367_v53 = vmul.f32 %v322_v50, %v239_v45  ;;  %v348_v54 = vmul.f32 %v277_v51, %v220_v46  ;;  %v349_v55 = vmul.f32 %v277_v51, %v221_v47  ;;  %v267_v56 = vpop.permute.xlu0 %266  ;;  %v236_v46 = vld [vmem:[%s837_s6 + $0xa0] sm:$0xff]  ;;  %v237_v47 = vld [vmem:[%s837_s6 + $0xa8] sm:$0xff] }
  0xa4   : > { %v344_v57 = vmul.f32 %v267_v56, %v216_v48  ;;  %v345_v58 = vmul.f32 %v267_v56, %v217_v49  ;;  %v234_v48 = vld [vmem:[%s837_s6 + $0x90] sm:$0xff]  ;;  %v235_v49 = vld [vmem:[%s837_s6 + $0x98] sm:$0xff] }
  0xa5   : > { %v404_v59 = vmul.f32 %v870_v21, %v366_v52  ;;  %v405_v60 = vmul.f32 %v872_v22, %v367_v53  ;;  %v386_v61 = vmul.f32 %v870_v21, %v348_v54  ;;  %v387_v62 = vmul.f32 %v872_v22, %v349_v55 }
  0xa6   : > { %v382_v63 = vmul.f32 %v870_v21, %v344_v57  ;;  %v383_v0 = vmul.f32 %v872_v22, %v345_v58 }
  0xa7   : > { %v425_v1 = vpack.c.bf16 %v405_v60, %v404_v59  ;;  %v416_v2 = vpack.c.bf16 %v387_v62, %v386_v61  ;;  %v242_v62 = vld [vmem:[%s837_s6 + $0xd0] sm:$0xff] }
  0xa8   : > { %v414_v4 = vpack.c.bf16 %v383_v0, %v382_v63  ;;  %v243_v63 = vld [vmem:[%s837_s6 + $0xd8] sm:$0xff]  ;;  %v240_v0 = vld [vmem:[%s837_s6 + $0xc0] sm:$0xff] }
  0xa9   : > { %441 = vst [vmem:[%s879_s19 + $0x58] sm:$0xff] %v425_v1  ;;  %v241_v1 = vld [vmem:[%s837_s6 + $0xc8] sm:$0xff] }
  0xaa   : > { %432 = vst [vmem:[%s879_s19 + $0x10] sm:$0xff] %v416_v2  ;;  %v337_v10 = vpop.permute.xlu2 %336  ;;  %v282_v11 = vpop.permute.xlu1 %281 }
  0xab   : > { %430 = vst [vmem:[%s879_s19] sm:$0xff] %v414_v4  ;;  %v372_v12 = vmul.f32 %v337_v10, %v244_v3  ;;  %v373_v13 = vmul.f32 %v337_v10, %v245_v5  ;;  %v350_v14 = vmul.f32 %v282_v11, %v222_v6  ;;  %v351_v15 = vmul.f32 %v282_v11, %v223_v7  ;;  %v272_v16 = vpop.permute.xlu0 %271 }
  0xac   : > { %v346_v17 = vmul.f32 %v272_v16, %v218_v8  ;;  %v347_v18 = vmul.f32 %v272_v16, %v219_v9 }
  0xad   : > { %v410_v19 = vmul.f32 %v870_v21, %v372_v12  ;;  %v411_v20 = vmul.f32 %v872_v22, %v373_v13  ;;  %v388_v23 = vmul.f32 %v870_v21, %v350_v14  ;;  %v389_v24 = vmul.f32 %v872_v22, %v351_v15  ;;  %v246_v14 = vld [vmem:[%s837_s6 + $0xf0] sm:$0xff]  ;;  %v247_v15 = vld [vmem:[%s837_s6 + $0xf8] sm:$0xff]  ;;  %s670_s6 = scalar_lea.hbm %s669_s4, 128 }
  0xae   : > { %v384_v25 = vmul.f32 %v870_v21, %v346_v17  ;;  %v385_v26 = vmul.f32 %v872_v22, %v347_v18  ;;  %p671_p6 = scmp.ne.s32.totalorder %s669_s4, %s670_s6  ;;  %p676_p3 = scmp.lt.s32.totalorder %s674_s8, %s670_s6 }
  0xaf   : > { %v428_v27 = vpack.c.bf16 %v411_v20, %v410_v19  ;;  %v417_v28 = vpack.c.bf16 %v389_v24, %v388_v23 }
  0xb0   : > { %v415_v29 = vpack.c.bf16 %v385_v26, %v384_v25  ;;  %p672_p13 = pnand %p671_p6, %p797_p11  ;;  %p677_p4 = por %p676_p3, %p675_p1 }
  0xb1   : > { %444 = vst [vmem:[%s879_s19 + $0x70] sm:$0xff] %v428_v27 }
  0xb2   : > { %433 = vst [vmem:[%s879_s19 + $0x18] sm:$0xff] %v417_v28  ;;  %v302_v34 = vpop.permute.xlu1 %301  ;;  %p673_p0 = pneg %p672_p13 }
  0xb3   : > { %431 = vst [vmem:[%s879_s19 + $0x8] sm:$0xff] %v415_v29  ;;  %v358_v35 = vmul.f32 %v302_v34, %v230_v30  ;;  %v359_v36 = vmul.f32 %v302_v34, %v231_v31  ;;  %v297_v37 = vpop.permute.xlu0 %296 }
  0xb4   : > { %v356_v38 = vmul.f32 %v297_v37, %v228_v32  ;;  %v357_v39 = vmul.f32 %v297_v37, %v229_v33  ;;  %p678_p7 = pnand %p677_p4, %p673_p0 }
  0xb5   : > { %v396_v40 = vmul.f32 %v870_v21, %v358_v35  ;;  %v397_v41 = vmul.f32 %v872_v22, %v359_v36 }
  0xb6   : > { %v394_v42 = vmul.f32 %v870_v21, %v356_v38  ;;  %v395_v43 = vmul.f32 %v872_v22, %v357_v39 }
  0xb7   : > { %v421_v44 = vpack.c.bf16 %v397_v41, %v396_v40 }
  0xb8   : > { %v420_v45 = vpack.c.bf16 %v395_v43, %v394_v42 }
  0xb9   : > { %437 = vst [vmem:[%s879_s19 + $0x38] sm:$0xff] %v421_v44 }
  0xba   : > { %436 = vst [vmem:[%s879_s19 + $0x30] sm:$0xff] %v420_v45  ;;  %v317_v50 = vpop.permute.xlu1 %316 }
  0xbb   : > { %v364_v51 = vmul.f32 %v317_v50, %v236_v46  ;;  %v365_v52 = vmul.f32 %v317_v50, %v237_v47  ;;  %v312_v53 = vpop.permute.xlu0 %311 }
  0xbc   : > { %v362_v54 = vmul.f32 %v312_v53, %v234_v48  ;;  %v363_v55 = vmul.f32 %v312_v53, %v235_v49 }
  0xbd   : > { %v402_v56 = vmul.f32 %v870_v21, %v364_v51  ;;  %v403_v57 = vmul.f32 %v872_v22, %v365_v52 }
  0xbe   : > { %v400_v58 = vmul.f32 %v870_v21, %v362_v54  ;;  %v401_v59 = vmul.f32 %v872_v22, %v363_v55 }
  0xbf   : > { %v424_v60 = vpack.c.bf16 %v403_v57, %v402_v56 }
  0xc0   : > { %v423_v61 = vpack.c.bf16 %v401_v59, %v400_v58 }
  0xc1   : > { %440 = vst [vmem:[%s879_s19 + $0x50] sm:$0xff] %v424_v60 }
  0xc2   : > { %439 = vst [vmem:[%s879_s19 + $0x48] sm:$0xff] %v423_v61  ;;  %v332_v2 = vpop.permute.xlu1 %331 }
  0xc3   : > { %v370_v3 = vmul.f32 %v332_v2, %v242_v62  ;;  %v371_v4 = vmul.f32 %v332_v2, %v243_v63  ;;  %v327_v5 = vpop.permute.xlu0 %326 }
  0xc4   : > { %v368_v6 = vmul.f32 %v327_v5, %v240_v0  ;;  %v369_v7 = vmul.f32 %v327_v5, %v241_v1 }
  0xc5   : > { %v408_v8 = vmul.f32 %v870_v21, %v370_v3  ;;  %v409_v9 = vmul.f32 %v872_v22, %v371_v4 }
  0xc6   : > { %v406_v10 = vmul.f32 %v870_v21, %v368_v6  ;;  %v407_v11 = vmul.f32 %v872_v22, %v369_v7 }
  0xc7   : > { %v427_v12 = vpack.c.bf16 %v409_v9, %v408_v8 }
  0xc8   : > { %v426_v13 = vpack.c.bf16 %v407_v11, %v406_v10 }
  0xc9   : > { %443 = vst [vmem:[%s879_s19 + $0x68] sm:$0xff] %v427_v12 }
  0xca   : > { %442 = vst [vmem:[%s879_s19 + $0x60] sm:$0xff] %v426_v13 }
  0xcb   : > { %v342_v16 = vpop.permute.xlu0 %341 }
  0xcc   : > { %v374_v17 = vmul.f32 %v342_v16, %v246_v14  ;;  %v375_v18 = vmul.f32 %v342_v16, %v247_v15 }
  0xce   : > { %v412_v19 = vmul.f32 %v870_v21, %v374_v17  ;;  %v413_v20 = vmul.f32 %v872_v22, %v375_v18 }
  0xd0   : > { %v429_v23 = vpack.c.bf16 %v413_v20, %v412_v19 }
  0xd2   : > { %445 = vst [vmem:[%s879_s19 + $0x78] sm:$0xff] %v429_v23 }
  0xd3   : > { %681 = shalt.err (!%p678_p7)
}
  0xd4   : > { %s725_s29 = smov 128   ;;  %s726_s23 = smov 8  }
  0xd5   : > { %572 = dma.vmem_to_hbm [thread:$0]  (%p797_p11), %s461_s28, 2048, %s463_s30, %s447_s16, %s725_s29, %s725_s29, %s726_s23  }
  0xd6 PF: > { %s477_s11 = sand.u32 1, %s708_s12   ;;  %p998_p5 = scmp.ge.s32.totalorder %s720_s15, 2 }
  0xd7   : > { %s478_s17 = scalar_lea.sflag [#allocation4], %s477_s11 }
  0xd8   : > { %p579_p8 = pnand %p998_p5, %p801_p12 }
  0xda   : > { %p580_p10 = pneg %p579_p8 }
  0xdc   : > { %703 = dma.done.wait (%p580_p10), %s478_s17, 2048  }
  0xdd   : > { %705 = vsyncadd (%p580_p10), %s478_s17, 4294965248  ;;  %p16_p2 = scmp.ge.s32.totalorder %s772_s18, 4   ;;  %s999_s12 = smov %s712_s13 }
  0xde   : > { %s1000_s13 = smov %s716_s14  ;;  %s1001_s14 = smov %s784_s21 }
  0xdf   : > { %s1002_s15 = smov %s772_s18  ;;  %18 = sbr.rel (!%p16_p2) target bundleno = 5 (0x5), region = 80 }
  0xe4   :  { %484 = vsyncpa [#allocation3], 1 }
  0xe5   :  { %486 = vsyncpa [#allocation3 + $0x1], 1 }
  0xe6   :  { %487 = vsyncpa [#allocation4], 1 }
  0xe7   :  { %489 = vsyncpa [#allocation4 + $0x1], 1 }

</bundles_post_ra>
